<compile_context>
chip_gen: v5e
topology: v5e:2x2
jax: 0.10.0
libtpu: 0.0.40
codegen_flags: <defaults>
</compile_context>

<pallas_src>
import functools

import jax
import jax.numpy as jnp
from jax import lax
from jax.experimental import pallas as pl
from jax.experimental.pallas import tpu as pltpu

EPS = 1e-5          # nn.InstanceNorm2d default eps
NEG_SLOPE = 0.2     # nn.LeakyReLU(0.2)


# ----------------------------------------------------------------------------
# Wrapper-side weight re-packing (plain XLA, tiny tensors, done once).
# ----------------------------------------------------------------------------
def _conv3x3_as_band_matmuls(w_oihw, width):
    """OIHW (Cout, Cin, 3, 3) -> [3, W*Cin, W*Cout] per-row-tap matmul weights.

    Wk[ky][wi*Cin + ci, wo*Cout + co] = w[co, ci, ky, wi - wo + 1] (0 outside the
    3-tap band), so the horizontal taps + SAME zero padding + channel mixing are
    all folded into one matmul per vertical tap.
    """
    cout, cin, kh, kw = w_oihw.shape
    w_hwio = jnp.transpose(w_oihw, (2, 3, 1, 0))                 # [3, 3, Cin, Cout]
    wi = jnp.arange(width)[:, None]
    wo = jnp.arange(width)[None, :]
    kx = wi - wo + 1                                             # [W, W]
    valid = ((kx >= 0) & (kx < kw)).astype(w_oihw.dtype)
    kx_c = jnp.clip(kx, 0, kw - 1)
    big = w_hwio[:, kx_c, :, :]                                  # [3, W, W, Cin, Cout]
    big = big * valid[None, :, :, None, None]
    big = jnp.transpose(big, (0, 1, 3, 2, 4))                    # [3, W(wi), Cin, W(wo), Cout]
    return big.reshape(kh, width * cin, width * cout)


def _conv1x1_as_matmul(w_oihw, width):
    """OIHW (Cout, Cin, 1, 1) -> block-diagonal [W*Cin, W*Cout] matmul weight."""
    cout, cin = w_oihw.shape[:2]
    w_io = jnp.transpose(w_oihw[:, :, 0, 0], (1, 0))             # [Cin, Cout]
    eye = jnp.eye(width, dtype=w_oihw.dtype)
    big = eye[:, None, :, None] * w_io[None, :, None, :]         # [W, Cin, W, Cout]
    return big.reshape(width * cin, width * cout)


def _channel_sum_matrix(width, channels, dtype):
    """sel[w*C + c, c'] = (c == c'): reduces [*, W*C] over w per channel via MXU."""
    return jnp.tile(jnp.eye(channels, dtype=dtype), (width, 1))  # [W*C, C]


def _pick_batch_group(n, h, target_rows=256, min_rows=128):
    """Images per grid step.

    Prefer >=2 grid steps (v7x has 2 TensorCores) once each step already fills
    >= min_rows MXU rows; otherwise maximize M fill up to target_rows.
    """
    divisors = [d for d in range(1, n + 1) if n % d == 0]
    cands = [d for d in divisors
             if min_rows <= d * h <= target_rows and n // d >= 2]
    if cands:
        return min(cands)
    cands = [d for d in divisors if d * h <= target_rows]
    return max(cands) if cands else 1


# ----------------------------------------------------------------------------
# Kernel
# ----------------------------------------------------------------------------
def resblock_kernel(x_ref, wk1_ref, wk2_ref, w1x1_ref,
                    sel_i_ref, selT_i_ref, sel_o_ref, selT_o_ref,
                    seg_red_ref, seg_exp_ref,
                    o_ref, *, h, hw):
    x = x_ref[0]                       # [M, W*Cin], M = Nb*H (batch folded into rows)
    M = x.shape[0]
    inv_hw = 1.0 / hw

    seg_red = seg_red_ref[...]         # [Nb, M]  per-image row reduction (0/1)
    seg_exp = seg_exp_ref[...]         # [M, Nb]  per-image row broadcast (0/1)

    # Image-boundary row masks for the vertical conv taps (per-image SAME pad).
    row = lax.broadcasted_iota(jnp.int32, (M, 1), 0)
    row_in_img = row % h
    top_row = row_in_img == 0          # first row of each image
    bot_row = row_in_img == (h - 1)    # last row of each image

    def inorm_lrelu(v, sel, selT):
        """Per-image InstanceNorm (affine=False, biased var) + LeakyReLU(0.2)."""
        # Per-image, per-channel mean: reduce rows with seg_red, lanes with sel.
        sum_rows = jnp.dot(seg_red, v, preferred_element_type=jnp.float32)       # [Nb, WC]
        mean_img = jnp.dot(sum_rows, sel,
                           preferred_element_type=jnp.float32) * inv_hw          # [Nb, C]
        mean_full = jnp.dot(
            seg_exp,
            jnp.dot(mean_img, selT, preferred_element_type=jnp.float32),
            preferred_element_type=jnp.float32)                                  # [M, WC]
        vc = v - mean_full
        ssq_rows = jnp.dot(seg_red, vc * vc, preferred_element_type=jnp.float32) # [Nb, WC]
        var_img = jnp.dot(ssq_rows, sel,
                          preferred_element_type=jnp.float32) * inv_hw           # [Nb, C]
        scale_img = lax.rsqrt(var_img + EPS)
        scale_full = jnp.dot(
            seg_exp,
            jnp.dot(scale_img, selT, preferred_element_type=jnp.float32),
            preferred_element_type=jnp.float32)                                  # [M, WC]
        y = vc * scale_full
        return jnp.where(y >= 0, y, NEG_SLOPE * y)

    def conv3x3(a, wk_ref):
        """3x3 stride-1 SAME conv: XLU sublane rolls for +/-1 rows + 3 band matmuls."""
        # up[r] = a[r-1], dn[r] = a[r+1]; zero the rows that cross an image edge.
        up = jnp.where(top_row, 0.0, pltpu.roll(a, shift=1, axis=0))
        dn = jnp.where(bot_row, 0.0, pltpu.roll(a, shift=M - 1, axis=0))
        acc = jnp.dot(up, wk_ref[0], preferred_element_type=jnp.float32)
        acc = acc + jnp.dot(a, wk_ref[1], preferred_element_type=jnp.float32)
        acc = acc + jnp.dot(dn, wk_ref[2], preferred_element_type=jnp.float32)
        return acc

    sel_i, selT_i = sel_i_ref[...], selT_i_ref[...]
    sel_o, selT_o = sel_o_ref[...], selT_o_ref[...]

    # Branch 1: IN -> LReLU -> conv3x3 -> (identity resize) -> IN -> LReLU -> conv3x3
    a1 = inorm_lrelu(x, sel_i, selT_i)
    f1 = conv3x3(a1, wk1_ref)
    # TODO(synk): Interpolate(scale_factor=1, 'bilinear', align_corners=False) is the
    #             identity; a general bilinear resize is not implemented.
    a2 = inorm_lrelu(f1, sel_o, selT_o)
    f1 = conv3x3(a2, wk2_ref)

    # Branch 2: conv1x1 on the raw input (+ identity resize)
    f2 = jnp.dot(x, w1x1_ref[...], preferred_element_type=jnp.float32)

    o_ref[0] = (f1 + f2).astype(o_ref.dtype)


# ----------------------------------------------------------------------------
# Wrapper
# ----------------------------------------------------------------------------
def resblock_forward(x_nchw, w1_oihw, w2_oihw, w3_oihw):
    """Pallas ResBlock forward. Inputs/outputs are NCHW like the PyTorch module."""
    N, Cin, H, W = x_nchw.shape
    Cout = w1_oihw.shape[0]

    nb = _pick_batch_group(N, H)        # images per grid step
    G = N // nb                         # grid length
    M = nb * H                          # rows per slab (matmul M dimension)

    # NCHW -> lane-dense [G, Nb*H, W*C] (the reshape after the NHWC transpose is
    # a contiguous view; at scale keep this layout end-to-end to avoid the HBM
    # round trips of the wrapper transposes).
    x_slab = jnp.transpose(x_nchw, (0, 2, 3, 1)).reshape(G, M, W * Cin)

    wk1 = _conv3x3_as_band_matmuls(w1_oihw, W)          # [3, W*Cin,  W*Cout]
    wk2 = _conv3x3_as_band_matmuls(w2_oihw, W)          # [3, W*Cout, W*Cout]
    w1x1 = _conv1x1_as_matmul(w3_oihw, W)               # [W*Cin, W*Cout]
    sel_i = _channel_sum_matrix(W, Cin, jnp.float32)    # [W*Cin, Cin]
    sel_o = _channel_sum_matrix(W, Cout, jnp.float32)   # [W*Cout, Cout]
    selT_i = jnp.transpose(sel_i)                       # [Cin, W*Cin]
    selT_o = jnp.transpose(sel_o)                       # [Cout, W*Cout]
    # Segment (image) reduce / broadcast matrices over the stacked rows.
    img_id = jnp.repeat(jnp.arange(nb), H)                                    # [M]
    seg_exp = (img_id[:, None] == jnp.arange(nb)[None, :]).astype(jnp.float32)  # [M, Nb]
    seg_red = jnp.transpose(seg_exp)                                          # [Nb, M]

    kernel = functools.partial(resblock_kernel, h=H, hw=H * W)
    out_slab = pl.pallas_call(
        kernel,
        out_shape=jax.ShapeDtypeStruct((G, M, W * Cout), jnp.float32),
        grid_spec=pltpu.PrefetchScalarGridSpec(
            num_scalar_prefetch=0,
            grid=(G,),
            in_specs=[
                pl.BlockSpec((1, M, W * Cin), lambda g: (g, 0, 0)),
                pl.BlockSpec((3, W * Cin, W * Cout), lambda g: (0, 0, 0)),
                pl.BlockSpec((3, W * Cout, W * Cout), lambda g: (0, 0, 0)),
                pl.BlockSpec((W * Cin, W * Cout), lambda g: (0, 0)),
                pl.BlockSpec((W * Cin, Cin), lambda g: (0, 0)),
                pl.BlockSpec((Cin, W * Cin), lambda g: (0, 0)),
                pl.BlockSpec((W * Cout, Cout), lambda g: (0, 0)),
                pl.BlockSpec((Cout, W * Cout), lambda g: (0, 0)),
                pl.BlockSpec((nb, M), lambda g: (0, 0)),
                pl.BlockSpec((M, nb), lambda g: (0, 0)),
            ],
            out_specs=pl.BlockSpec((1, M, W * Cout), lambda g: (g, 0, 0)),
        ),
        compiler_params=pltpu.CompilerParams(
            dimension_semantics=("parallel",)),      # batch-group axis is independent
    )(x_slab, wk1, wk2, w1x1, sel_i, selT_i, sel_o, selT_o, seg_red, seg_exp)

    # [G, Nb*H, W*Cout] -> NCHW
    return out_slab.reshape(N, H, W, Cout).transpose(0, 3, 1, 2)


# ----------------------------------------------------------------------------
# Pure-JAX reference with PyTorch semantics (NCHW / OIHW).
# ----------------------------------------------------------------------------
def resblock_reference(x_nchw, w1, w2, w3):
    def inorm(x):
        m = x.mean(axis=(2, 3), keepdims=True)
        v = ((x - m) ** 2).mean(axis=(2, 3), keepdims=True)
        return (x - m) / jnp.sqrt(v + EPS)

    def lrelu(x):
        return jnp.where(x >= 0, x, NEG_SLOPE * x)

    dn = ('NCHW', 'OIHW', 'NCHW')
    conv = lambda x, w: lax.conv_general_dilated(
        x, w, (1, 1), 'SAME', dimension_numbers=dn)

    f1 = conv(lrelu(inorm(x_nchw)), w1)
    f1 = conv(lrelu(inorm(f1)), w2)
    f2 = conv(x_nchw, w3)
    return f1 + f2


if __name__ == "__main__":
    key = jax.random.PRNGKey(0)
    k1, k2, k3, k4 = jax.random.split(key, 4)

    # ResBlock(in_c=4, out_c=8), batch=2, spatial 16x16  (W*Cout = 128 lanes)
    N, Cin, Cout, H, W = 2, 4, 8, 16, 16
    x = jax.random.normal(k1, (N, Cin, H, W), jnp.float32)
    # Deterministic synthetic weights (all convs are bias=False in the module).
    w1 = jax.random.normal(k2, (Cout, Cin, 3, 3), jnp.float32) * 0.1
    w2 = jax.random.normal(k3, (Cout, Cout, 3, 3), jnp.float32) * 0.1
    w3 = jax.random.normal(k4, (Cout, Cin, 1, 1), jnp.float32) * 0.1

    out = jax.block_until_ready(resblock_forward(x, w1, w2, w3))
    ref = jax.block_until_ready(resblock_reference(x, w1, w2, w3))

    assert out.shape == (N, Cout, H, W), out.shape
    if not jnp.allclose(out, ref, rtol=1e-4, atol=1e-4):
        raise AssertionError(
            f"mismatch vs reference, max abs err = {jnp.max(jnp.abs(out - ref))}")
    print("KERNEL_OK")
</pallas_src>

<mosaic_0001>
module attributes {stable_mosaic.version = 11 : i64} {
  func.func @resblock_kernel(%arg0: i32, %arg1: memref<1x32x64xf32, #tpu.memory_space<vmem>>, %arg2: memref<3x64x128xf32, #tpu.memory_space<vmem>>, %arg3: memref<3x128x128xf32, #tpu.memory_space<vmem>>, %arg4: memref<64x128xf32, #tpu.memory_space<vmem>>, %arg5: memref<64x4xf32, #tpu.memory_space<vmem>>, %arg6: memref<4x64xf32, #tpu.memory_space<vmem>>, %arg7: memref<128x8xf32, #tpu.memory_space<vmem>>, %arg8: memref<8x128xf32, #tpu.memory_space<vmem>>, %arg9: memref<2x32xf32, #tpu.memory_space<vmem>>, %arg10: memref<32x2xf32, #tpu.memory_space<vmem>>, %arg11: memref<1x32x128xf32, #tpu.memory_space<vmem>>) attributes {dimension_semantics = [#tpu.dimension_semantics<parallel>], iteration_bounds = array<i64: 1>, scalar_prefetch = 0 : i64, scratch_operands = 0 : i64, tpu.core_type = #tpu.core_type<tc>, window_params = [{transform_indices = @transform_0, window_bounds = array<i64: 1, 32, 64>}, {pipeline_mode = #tpu.pipeline_mode<synchronous>, transform_indices = @transform_1, window_bounds = array<i64: 3, 64, 128>}, {pipeline_mode = #tpu.pipeline_mode<synchronous>, transform_indices = @transform_2, window_bounds = array<i64: 3, 128, 128>}, {pipeline_mode = #tpu.pipeline_mode<synchronous>, transform_indices = @transform_3, window_bounds = array<i64: 64, 128>}, {pipeline_mode = #tpu.pipeline_mode<synchronous>, transform_indices = @transform_4, window_bounds = array<i64: 64, 4>}, {pipeline_mode = #tpu.pipeline_mode<synchronous>, transform_indices = @transform_5, window_bounds = array<i64: 4, 64>}, {pipeline_mode = #tpu.pipeline_mode<synchronous>, transform_indices = @transform_6, window_bounds = array<i64: 128, 8>}, {pipeline_mode = #tpu.pipeline_mode<synchronous>, transform_indices = @transform_7, window_bounds = array<i64: 8, 128>}, {pipeline_mode = #tpu.pipeline_mode<synchronous>, transform_indices = @transform_8, window_bounds = array<i64: 2, 32>}, {pipeline_mode = #tpu.pipeline_mode<synchronous>, transform_indices = @transform_9, window_bounds = array<i64: 32, 2>}, {transform_indices = @transform_10, window_bounds = array<i64: 1, 32, 128>}]} {
    %c0 = arith.constant 0 : index
    %c0_0 = arith.constant 0 : index
    %c0_1 = arith.constant 0 : index
    %0 = vector.load %arg1[%c0, %c0_0, %c0_1] : memref<1x32x64xf32, #tpu.memory_space<vmem>>, vector<1x32x64xf32>
    %1 = vector.shape_cast %0 : vector<1x32x64xf32> to vector<32x64xf32>
    %c0_2 = arith.constant 0 : index
    %c0_3 = arith.constant 0 : index
    %2 = vector.load %arg9[%c0_2, %c0_3] : memref<2x32xf32, #tpu.memory_space<vmem>>, vector<2x32xf32>
    %c0_4 = arith.constant 0 : index
    %c0_5 = arith.constant 0 : index
    %3 = vector.load %arg10[%c0_4, %c0_5] : memref<32x2xf32, #tpu.memory_space<vmem>>, vector<32x2xf32>
    %4 = tpu.iota {dimensions = array<i32: 0>} : vector<32x1xi32>
    %c16_i32 = arith.constant 16 : i32
    %c0_i32 = arith.constant 0 : i32
    %5 = arith.cmpi eq, %c16_i32, %c0_i32 : i32
    %c1_i32 = arith.constant 1 : i32
    %6 = arith.select %5, %c1_i32, %c16_i32 : i32
    %7 = vector.broadcast %6 : i32 to vector<32x1xi32>
    %8 = arith.remsi %4, %7 : vector<32x1xi32>
    %c0_i32_6 = arith.constant 0 : i32
    %9 = vector.broadcast %c0_i32_6 : i32 to vector<32x1xi32>
    %10 = arith.cmpi ne, %8, %9 : vector<32x1xi32>
    %c0_i32_7 = arith.constant 0 : i32
    %11 = vector.broadcast %c0_i32_7 : i32 to vector<32x1xi32>
    %12 = arith.cmpi slt, %8, %11 : vector<32x1xi32>
    %c0_i32_8 = arith.constant 0 : i32
    %13 = arith.cmpi slt, %6, %c0_i32_8 : i32
    %14 = vector.broadcast %13 : i1 to vector<32x1xi1>
    %15 = vector.broadcast %14 : vector<32x1xi1> to vector<32x1xi1>
    %16 = arith.xori %12, %15 : vector<32x1xi1>
    %17 = arith.andi %16, %10 : vector<32x1xi1>
    %18 = vector.broadcast %6 : i32 to vector<32x1xi32>
    %19 = arith.addi %8, %18 : vector<32x1xi32>
    %20 = arith.select %17, %19, %8 : vector<32x1xi1>, vector<32x1xi32>
    %c0_i32_9 = arith.constant 0 : i32
    %21 = vector.broadcast %c0_i32_9 : i32 to vector<32x1xi32>
    %22 = arith.cmpi eq, %20, %21 : vector<32x1xi32>
    %c15_i32 = arith.constant 15 : i32
    %23 = vector.broadcast %c15_i32 : i32 to vector<32x1xi32>
    %24 = arith.cmpi eq, %20, %23 : vector<32x1xi32>
    %c0_10 = arith.constant 0 : index
    %c0_11 = arith.constant 0 : index
    %25 = vector.load %arg5[%c0_10, %c0_11] : memref<64x4xf32, #tpu.memory_space<vmem>>, vector<64x4xf32>
    %c0_12 = arith.constant 0 : index
    %c0_13 = arith.constant 0 : index
    %26 = vector.load %arg6[%c0_12, %c0_13] : memref<4x64xf32, #tpu.memory_space<vmem>>, vector<4x64xf32>
    %c0_14 = arith.constant 0 : index
    %c0_15 = arith.constant 0 : index
    %27 = vector.load %arg7[%c0_14, %c0_15] : memref<128x8xf32, #tpu.memory_space<vmem>>, vector<128x8xf32>
    %c0_16 = arith.constant 0 : index
    %c0_17 = arith.constant 0 : index
    %28 = vector.load %arg8[%c0_16, %c0_17] : memref<8x128xf32, #tpu.memory_space<vmem>>, vector<8x128xf32>
    %cst = arith.constant dense<0.000000e+00> : vector<2x64xf32>
    %29 = tpu.matmul %2, %1, %cst {dimension_numbers = #tpu.dot_dimension_numbers<[1], [0], [0], [1], [0, 0, 1, 1], [], []>} : vector<2x32xf32>, vector<32x64xf32>, vector<2x64xf32> -> vector<2x64xf32>
    %cst_18 = arith.constant dense<0.000000e+00> : vector<2x4xf32>
    %30 = tpu.matmul %29, %25, %cst_18 {dimension_numbers = #tpu.dot_dimension_numbers<[1], [0], [0], [1], [0, 0, 1, 1], [], []>} : vector<2x64xf32>, vector<64x4xf32>, vector<2x4xf32> -> vector<2x4xf32>
    %cst_19 = arith.constant 3.906250e-03 : f32
    %31 = vector.broadcast %cst_19 : f32 to vector<2x4xf32>
    %32 = arith.mulf %30, %31 : vector<2x4xf32>
    %cst_20 = arith.constant dense<0.000000e+00> : vector<2x64xf32>
    %33 = tpu.matmul %32, %26, %cst_20 {dimension_numbers = #tpu.dot_dimension_numbers<[1], [0], [0], [1], [0, 0, 1, 1], [], []>} : vector<2x4xf32>, vector<4x64xf32>, vector<2x64xf32> -> vector<2x64xf32>
    %cst_21 = arith.constant dense<0.000000e+00> : vector<32x64xf32>
    %34 = tpu.matmul %3, %33, %cst_21 {dimension_numbers = #tpu.dot_dimension_numbers<[1], [0], [0], [1], [0, 0, 1, 1], [], []>} : vector<32x2xf32>, vector<2x64xf32>, vector<32x64xf32> -> vector<32x64xf32>
    %35 = arith.subf %1, %34 : vector<32x64xf32>
    %36 = arith.mulf %35, %35 : vector<32x64xf32>
    %cst_22 = arith.constant dense<0.000000e+00> : vector<2x64xf32>
    %37 = tpu.matmul %2, %36, %cst_22 {dimension_numbers = #tpu.dot_dimension_numbers<[1], [0], [0], [1], [0, 0, 1, 1], [], []>} : vector<2x32xf32>, vector<32x64xf32>, vector<2x64xf32> -> vector<2x64xf32>
    %cst_23 = arith.constant dense<0.000000e+00> : vector<2x4xf32>
    %38 = tpu.matmul %37, %25, %cst_23 {dimension_numbers = #tpu.dot_dimension_numbers<[1], [0], [0], [1], [0, 0, 1, 1], [], []>} : vector<2x64xf32>, vector<64x4xf32>, vector<2x4xf32> -> vector<2x4xf32>
    %cst_24 = arith.constant 3.906250e-03 : f32
    %39 = vector.broadcast %cst_24 : f32 to vector<2x4xf32>
    %40 = arith.mulf %38, %39 : vector<2x4xf32>
    %cst_25 = arith.constant 9.99999974E-6 : f32
    %41 = vector.broadcast %cst_25 : f32 to vector<2x4xf32>
    %42 = arith.addf %40, %41 : vector<2x4xf32>
    %43 = math.rsqrt %42 : vector<2x4xf32>
    %cst_26 = arith.constant dense<0.000000e+00> : vector<2x64xf32>
    %44 = tpu.matmul %43, %26, %cst_26 {dimension_numbers = #tpu.dot_dimension_numbers<[1], [0], [0], [1], [0, 0, 1, 1], [], []>} : vector<2x4xf32>, vector<4x64xf32>, vector<2x64xf32> -> vector<2x64xf32>
    %cst_27 = arith.constant dense<0.000000e+00> : vector<32x64xf32>
    %45 = tpu.matmul %3, %44, %cst_27 {dimension_numbers = #tpu.dot_dimension_numbers<[1], [0], [0], [1], [0, 0, 1, 1], [], []>} : vector<32x2xf32>, vector<2x64xf32>, vector<32x64xf32> -> vector<32x64xf32>
    %46 = arith.mulf %35, %45 : vector<32x64xf32>
    %cst_28 = arith.constant 0.000000e+00 : f32
    %47 = vector.broadcast %cst_28 : f32 to vector<32x64xf32>
    %48 = arith.cmpf oge, %46, %47 : vector<32x64xf32>
    %cst_29 = arith.constant 2.000000e-01 : f32
    %49 = vector.broadcast %cst_29 : f32 to vector<32x64xf32>
    %50 = arith.mulf %49, %46 : vector<32x64xf32>
    %51 = arith.select %48, %46, %50 : vector<32x64xi1>, vector<32x64xf32>
    %c1_i32_30 = arith.constant 1 : i32
    %52 = tpu.dynamic_rotate %51 by %c1_i32_30 dim 0 : vector<32x64xf32>, i32 -> vector<32x64xf32>
    %cst_31 = arith.constant 0.000000e+00 : f32
    %53 = vector.shape_cast %22 : vector<32x1xi1> to vector<32x1xi1>
    %54 = vector.broadcast %53 : vector<32x1xi1> to vector<32x64xi1>
    %55 = vector.broadcast %cst_31 : f32 to vector<32x64xf32>
    %56 = arith.select %54, %55, %52 : vector<32x64xi1>, vector<32x64xf32>
    %c31_i32 = arith.constant 31 : i32
    %57 = tpu.dynamic_rotate %51 by %c31_i32 dim 0 : vector<32x64xf32>, i32 -> vector<32x64xf32>
    %cst_32 = arith.constant 0.000000e+00 : f32
    %58 = vector.shape_cast %24 : vector<32x1xi1> to vector<32x1xi1>
    %59 = vector.broadcast %58 : vector<32x1xi1> to vector<32x64xi1>
    %60 = vector.broadcast %cst_32 : f32 to vector<32x64xf32>
    %61 = arith.select %59, %60, %57 : vector<32x64xi1>, vector<32x64xf32>
    %c0_33 = arith.constant 0 : index
    %c0_34 = arith.constant 0 : index
    %c0_35 = arith.constant 0 : index
    %62 = vector.load %arg2[%c0_33, %c0_34, %c0_35] : memref<3x64x128xf32, #tpu.memory_space<vmem>>, vector<1x64x128xf32>
    %63 = vector.shape_cast %62 : vector<1x64x128xf32> to vector<64x128xf32>
    %cst_36 = arith.constant dense<0.000000e+00> : vector<32x128xf32>
    %64 = tpu.matmul %56, %63, %cst_36 {dimension_numbers = #tpu.dot_dimension_numbers<[1], [0], [0], [1], [0, 0, 1, 1], [], []>} : vector<32x64xf32>, vector<64x128xf32>, vector<32x128xf32> -> vector<32x128xf32>
    %c1 = arith.constant 1 : index
    %c0_37 = arith.constant 0 : index
    %c0_38 = arith.constant 0 : index
    %65 = vector.load %arg2[%c1, %c0_37, %c0_38] : memref<3x64x128xf32, #tpu.memory_space<vmem>>, vector<1x64x128xf32>
    %66 = vector.shape_cast %65 : vector<1x64x128xf32> to vector<64x128xf32>
    %cst_39 = arith.constant dense<0.000000e+00> : vector<32x128xf32>
    %67 = tpu.matmul %51, %66, %cst_39 {dimension_numbers = #tpu.dot_dimension_numbers<[1], [0], [0], [1], [0, 0, 1, 1], [], []>} : vector<32x64xf32>, vector<64x128xf32>, vector<32x128xf32> -> vector<32x128xf32>
    %68 = arith.addf %64, %67 : vector<32x128xf32>
    %c2 = arith.constant 2 : index
    %c0_40 = arith.constant 0 : index
    %c0_41 = arith.constant 0 : index
    %69 = vector.load %arg2[%c2, %c0_40, %c0_41] : memref<3x64x128xf32, #tpu.memory_space<vmem>>, vector<1x64x128xf32>
    %70 = vector.shape_cast %69 : vector<1x64x128xf32> to vector<64x128xf32>
    %cst_42 = arith.constant dense<0.000000e+00> : vector<32x128xf32>
    %71 = tpu.matmul %61, %70, %cst_42 {dimension_numbers = #tpu.dot_dimension_numbers<[1], [0], [0], [1], [0, 0, 1, 1], [], []>} : vector<32x64xf32>, vector<64x128xf32>, vector<32x128xf32> -> vector<32x128xf32>
    %72 = arith.addf %68, %71 : vector<32x128xf32>
    %cst_43 = arith.constant dense<0.000000e+00> : vector<2x128xf32>
    %73 = tpu.matmul %2, %72, %cst_43 {dimension_numbers = #tpu.dot_dimension_numbers<[1], [0], [0], [1], [0, 0, 1, 1], [], []>} : vector<2x32xf32>, vector<32x128xf32>, vector<2x128xf32> -> vector<2x128xf32>
    %cst_44 = arith.constant dense<0.000000e+00> : vector<2x8xf32>
    %74 = tpu.matmul %73, %27, %cst_44 {dimension_numbers = #tpu.dot_dimension_numbers<[1], [0], [0], [1], [0, 0, 1, 1], [], []>} : vector<2x128xf32>, vector<128x8xf32>, vector<2x8xf32> -> vector<2x8xf32>
    %cst_45 = arith.constant 3.906250e-03 : f32
    %75 = vector.broadcast %cst_45 : f32 to vector<2x8xf32>
    %76 = arith.mulf %74, %75 : vector<2x8xf32>
    %cst_46 = arith.constant dense<0.000000e+00> : vector<2x128xf32>
    %77 = tpu.matmul %76, %28, %cst_46 {dimension_numbers = #tpu.dot_dimension_numbers<[1], [0], [0], [1], [0, 0, 1, 1], [], []>} : vector<2x8xf32>, vector<8x128xf32>, vector<2x128xf32> -> vector<2x128xf32>
    %cst_47 = arith.constant dense<0.000000e+00> : vector<32x128xf32>
    %78 = tpu.matmul %3, %77, %cst_47 {dimension_numbers = #tpu.dot_dimension_numbers<[1], [0], [0], [1], [0, 0, 1, 1], [], []>} : vector<32x2xf32>, vector<2x128xf32>, vector<32x128xf32> -> vector<32x128xf32>
    %79 = arith.subf %72, %78 : vector<32x128xf32>
    %80 = arith.mulf %79, %79 : vector<32x128xf32>
    %cst_48 = arith.constant dense<0.000000e+00> : vector<2x128xf32>
    %81 = tpu.matmul %2, %80, %cst_48 {dimension_numbers = #tpu.dot_dimension_numbers<[1], [0], [0], [1], [0, 0, 1, 1], [], []>} : vector<2x32xf32>, vector<32x128xf32>, vector<2x128xf32> -> vector<2x128xf32>
    %cst_49 = arith.constant dense<0.000000e+00> : vector<2x8xf32>
    %82 = tpu.matmul %81, %27, %cst_49 {dimension_numbers = #tpu.dot_dimension_numbers<[1], [0], [0], [1], [0, 0, 1, 1], [], []>} : vector<2x128xf32>, vector<128x8xf32>, vector<2x8xf32> -> vector<2x8xf32>
    %cst_50 = arith.constant 3.906250e-03 : f32
    %83 = vector.broadcast %cst_50 : f32 to vector<2x8xf32>
    %84 = arith.mulf %82, %83 : vector<2x8xf32>
    %cst_51 = arith.constant 9.99999974E-6 : f32
    %85 = vector.broadcast %cst_51 : f32 to vector<2x8xf32>
    %86 = arith.addf %84, %85 : vector<2x8xf32>
    %87 = math.rsqrt %86 : vector<2x8xf32>
    %cst_52 = arith.constant dense<0.000000e+00> : vector<2x128xf32>
    %88 = tpu.matmul %87, %28, %cst_52 {dimension_numbers = #tpu.dot_dimension_numbers<[1], [0], [0], [1], [0, 0, 1, 1], [], []>} : vector<2x8xf32>, vector<8x128xf32>, vector<2x128xf32> -> vector<2x128xf32>
    %cst_53 = arith.constant dense<0.000000e+00> : vector<32x128xf32>
    %89 = tpu.matmul %3, %88, %cst_53 {dimension_numbers = #tpu.dot_dimension_numbers<[1], [0], [0], [1], [0, 0, 1, 1], [], []>} : vector<32x2xf32>, vector<2x128xf32>, vector<32x128xf32> -> vector<32x128xf32>
    %90 = arith.mulf %79, %89 : vector<32x128xf32>
    %cst_54 = arith.constant 0.000000e+00 : f32
    %91 = vector.broadcast %cst_54 : f32 to vector<32x128xf32>
    %92 = arith.cmpf oge, %90, %91 : vector<32x128xf32>
    %cst_55 = arith.constant 2.000000e-01 : f32
    %93 = vector.broadcast %cst_55 : f32 to vector<32x128xf32>
    %94 = arith.mulf %93, %90 : vector<32x128xf32>
    %95 = arith.select %92, %90, %94 : vector<32x128xi1>, vector<32x128xf32>
    %c1_i32_56 = arith.constant 1 : i32
    %96 = tpu.dynamic_rotate %95 by %c1_i32_56 dim 0 : vector<32x128xf32>, i32 -> vector<32x128xf32>
    %cst_57 = arith.constant 0.000000e+00 : f32
    %97 = vector.shape_cast %22 : vector<32x1xi1> to vector<32x1xi1>
    %98 = vector.broadcast %97 : vector<32x1xi1> to vector<32x128xi1>
    %99 = vector.broadcast %cst_57 : f32 to vector<32x128xf32>
    %100 = arith.select %98, %99, %96 : vector<32x128xi1>, vector<32x128xf32>
    %c31_i32_58 = arith.constant 31 : i32
    %101 = tpu.dynamic_rotate %95 by %c31_i32_58 dim 0 : vector<32x128xf32>, i32 -> vector<32x128xf32>
    %cst_59 = arith.constant 0.000000e+00 : f32
    %102 = vector.shape_cast %24 : vector<32x1xi1> to vector<32x1xi1>
    %103 = vector.broadcast %102 : vector<32x1xi1> to vector<32x128xi1>
    %104 = vector.broadcast %cst_59 : f32 to vector<32x128xf32>
    %105 = arith.select %103, %104, %101 : vector<32x128xi1>, vector<32x128xf32>
    %c0_60 = arith.constant 0 : index
    %c0_61 = arith.constant 0 : index
    %c0_62 = arith.constant 0 : index
    %106 = vector.load %arg3[%c0_60, %c0_61, %c0_62] : memref<3x128x128xf32, #tpu.memory_space<vmem>>, vector<1x128x128xf32>
    %107 = vector.shape_cast %106 : vector<1x128x128xf32> to vector<128x128xf32>
    %cst_63 = arith.constant dense<0.000000e+00> : vector<32x128xf32>
    %108 = tpu.matmul %100, %107, %cst_63 {dimension_numbers = #tpu.dot_dimension_numbers<[1], [0], [0], [1], [0, 0, 1, 1], [], []>} : vector<32x128xf32>, vector<128x128xf32>, vector<32x128xf32> -> vector<32x128xf32>
    %c1_64 = arith.constant 1 : index
    %c0_65 = arith.constant 0 : index
    %c0_66 = arith.constant 0 : index
    %109 = vector.load %arg3[%c1_64, %c0_65, %c0_66] : memref<3x128x128xf32, #tpu.memory_space<vmem>>, vector<1x128x128xf32>
    %110 = vector.shape_cast %109 : vector<1x128x128xf32> to vector<128x128xf32>
    %cst_67 = arith.constant dense<0.000000e+00> : vector<32x128xf32>
    %111 = tpu.matmul %95, %110, %cst_67 {dimension_numbers = #tpu.dot_dimension_numbers<[1], [0], [0], [1], [0, 0, 1, 1], [], []>} : vector<32x128xf32>, vector<128x128xf32>, vector<32x128xf32> -> vector<32x128xf32>
    %112 = arith.addf %108, %111 : vector<32x128xf32>
    %c2_68 = arith.constant 2 : index
    %c0_69 = arith.constant 0 : index
    %c0_70 = arith.constant 0 : index
    %113 = vector.load %arg3[%c2_68, %c0_69, %c0_70] : memref<3x128x128xf32, #tpu.memory_space<vmem>>, vector<1x128x128xf32>
    %114 = vector.shape_cast %113 : vector<1x128x128xf32> to vector<128x128xf32>
    %cst_71 = arith.constant dense<0.000000e+00> : vector<32x128xf32>
    %115 = tpu.matmul %105, %114, %cst_71 {dimension_numbers = #tpu.dot_dimension_numbers<[1], [0], [0], [1], [0, 0, 1, 1], [], []>} : vector<32x128xf32>, vector<128x128xf32>, vector<32x128xf32> -> vector<32x128xf32>
    %116 = arith.addf %112, %115 : vector<32x128xf32>
    %c0_72 = arith.constant 0 : index
    %c0_73 = arith.constant 0 : index
    %117 = vector.load %arg4[%c0_72, %c0_73] : memref<64x128xf32, #tpu.memory_space<vmem>>, vector<64x128xf32>
    %cst_74 = arith.constant dense<0.000000e+00> : vector<32x128xf32>
    %118 = tpu.matmul %1, %117, %cst_74 {dimension_numbers = #tpu.dot_dimension_numbers<[1], [0], [0], [1], [0, 0, 1, 1], [], []>} : vector<32x64xf32>, vector<64x128xf32>, vector<32x128xf32> -> vector<32x128xf32>
    %119 = arith.addf %116, %118 : vector<32x128xf32>
    %c0_75 = arith.constant 0 : index
    %c0_76 = arith.constant 0 : index
    %c0_77 = arith.constant 0 : index
    %120 = vector.load %arg11[%c0_75, %c0_76, %c0_77] : memref<1x32x128xf32, #tpu.memory_space<vmem>>, vector<1x32x128xf32>
    %121 = vector.shape_cast %120 : vector<1x32x128xf32> to vector<32x128xf32>
    %122 = vector.shape_cast %119 : vector<32x128xf32> to vector<1x32x128xf32>
    tpu.vector_store %arg11[%c0_75, %c0_76, %c0_77], %122 {strides = array<i32>} : memref<1x32x128xf32, #tpu.memory_space<vmem>>, vector<1x32x128xf32>,
    return
  }
  func.func @transform_0(%arg0: i32) -> (i32, i32, i32) {
    %c0_i32 = arith.constant 0 : i32
    %c0_i32_0 = arith.constant 0 : i32
    %c0_i32_1 = arith.constant 0 : i32
    return %arg0, %c0_i32, %c0_i32_0 : i32, i32, i32
  }
  func.func @transform_1(%arg0: i32) -> (i32, i32, i32) {
    %c0_i32 = arith.constant 0 : i32
    %c0_i32_0 = arith.constant 0 : i32
    %c0_i32_1 = arith.constant 0 : i32
    %c0_i32_2 = arith.constant 0 : i32
    return %c0_i32, %c0_i32_0, %c0_i32_1 : i32, i32, i32
  }
  func.func @transform_2(%arg0: i32) -> (i32, i32, i32) {
    %c0_i32 = arith.constant 0 : i32
    %c0_i32_0 = arith.constant 0 : i32
    %c0_i32_1 = arith.constant 0 : i32
    %c0_i32_2 = arith.constant 0 : i32
    return %c0_i32, %c0_i32_0, %c0_i32_1 : i32, i32, i32
  }
  func.func @transform_3(%arg0: i32) -> (i32, i32) {
    %c0_i32 = arith.constant 0 : i32
    %c0_i32_0 = arith.constant 0 : i32
    %c0_i32_1 = arith.constant 0 : i32
    return %c0_i32, %c0_i32_0 : i32, i32
  }
  func.func @transform_4(%arg0: i32) -> (i32, i32) {
    %c0_i32 = arith.constant 0 : i32
    %c0_i32_0 = arith.constant 0 : i32
    %c0_i32_1 = arith.constant 0 : i32
    return %c0_i32, %c0_i32_0 : i32, i32
  }
  func.func @transform_5(%arg0: i32) -> (i32, i32) {
    %c0_i32 = arith.constant 0 : i32
    %c0_i32_0 = arith.constant 0 : i32
    %c0_i32_1 = arith.constant 0 : i32
    return %c0_i32, %c0_i32_0 : i32, i32
  }
  func.func @transform_6(%arg0: i32) -> (i32, i32) {
    %c0_i32 = arith.constant 0 : i32
    %c0_i32_0 = arith.constant 0 : i32
    %c0_i32_1 = arith.constant 0 : i32
    return %c0_i32, %c0_i32_0 : i32, i32
  }
  func.func @transform_7(%arg0: i32) -> (i32, i32) {
    %c0_i32 = arith.constant 0 : i32
    %c0_i32_0 = arith.constant 0 : i32
    %c0_i32_1 = arith.constant 0 : i32
    return %c0_i32, %c0_i32_0 : i32, i32
  }
  func.func @transform_8(%arg0: i32) -> (i32, i32) {
    %c0_i32 = arith.constant 0 : i32
    %c0_i32_0 = arith.constant 0 : i32
    %c0_i32_1 = arith.constant 0 : i32
    return %c0_i32, %c0_i32_0 : i32, i32
  }
  func.func @transform_9(%arg0: i32) -> (i32, i32) {
    %c0_i32 = arith.constant 0 : i32
    %c0_i32_0 = arith.constant 0 : i32
    %c0_i32_1 = arith.constant 0 : i32
    return %c0_i32, %c0_i32_0 : i32, i32
  }
  func.func @transform_10(%arg0: i32) -> (i32, i32, i32) {
    %c0_i32 = arith.constant 0 : i32
    %c0_i32_0 = arith.constant 0 : i32
    %c0_i32_1 = arith.constant 0 : i32
    return %arg0, %c0_i32, %c0_i32_0 : i32, i32, i32
  }
}

</mosaic_0001>

<bundles_post_ra>
// kernel: tpu_custom_call.1
= control target key start
LH: loop header
LB: loop body
LE: loop exit
PB: predicated region body
PF: predicated region fallthrough
CT: control target
= control target key end

     0   :  { %15 = vsyncpa [#allocation3], 0  ;;  %s1792_s0 = inlined_call_operand.vmem [shape: f32[1,32,64], index: 0, kind: input, shape index: {}]   ;;  %s1793_s1 = inlined_call_operand.vmem [shape: f32[3,64,128], index: 1, kind: input, shape index: {}]   ;;  %s1794_s2 = inlined_call_operand.hbm [shape: f32[3,128,128], index: 2, kind: input, shape index: {}]   ;;  %s1795_s3 = inlined_call_operand.hbm [shape: f32[64,128], index: 3, kind: input, shape index: {}]   ;;  %s1796_s4 = inlined_call_operand.vmem [shape: f32[64,4], index: 4, kind: input, shape index: {}]   ;;  %s1797_s5 = inlined_call_operand.hbm [shape: f32[4,64], index: 5, kind: input, shape index: {}]   ;;  %s1798_s6 = inlined_call_operand.vmem [shape: f32[128,8], index: 6, kind: input, shape index: {}]   ;;  %s1799_s7 = inlined_call_operand.hbm [shape: f32[8,128], index: 7, kind: input, shape index: {}]   ;;  %s1800_s8 = inlined_call_operand.vmem [shape: f32[2,32], index: 8, kind: input, shape index: {}]   ;;  %s1801_s9 = inlined_call_operand.vmem [shape: f32[32,2], index: 9, kind: input, shape index: {}]   ;;  %s1802_s10 = inlined_call_operand.hbm [shape: f32[1,32,128], index: 10, kind: output, shape index: {}]  }
   0x1   :  { %16 = vsyncpa [#allocation6], 0 }
   0x2   :  { %17 = vsyncpa [#allocation9], 0 }
   0x3   :  { %18 = vsyncpa [#allocation4], 0  ;;  %s40_s15 = sshll.u32 %s1795_s3, 4  ;;  %s1325_s16 = smov [#allocation5]   ;;  %s41_s15 = int_to_ptr.hbm [resolvable:$true] %s40_s15 }
   0x4   :  { %s42_s17 = sshll.u32 %s1325_s16, 4  ;;  %s27_s20 = sshll.u32 %s1794_s2, 4  ;;  %s43_s17 = int_to_ptr.vmem [resolvable:$true] %s42_s17  ;;  %s28_s20 = int_to_ptr.hbm [resolvable:$true] %s27_s20 }
   0x5   :  { %s1326_s21 = smov 128   ;;  %s1327_s22 = smov 8  }
   0x6   :  { %48 = dma.hbm_to_vmem [thread:$0]  %s41_s15, 1024, %s43_s17, [#allocation6], %s1326_s21, %s1326_s21, %s1327_s22  }
   0x7   :  { %s1328_s23 = smov [#allocation2]   ;;  %s56_s3 = sshll.u32 %s1797_s5, 4  ;;  %s57_s3 = int_to_ptr.hbm [resolvable:$true] %s56_s3 }
   0x8   :  { %s29_s24 = sshll.u32 %s1328_s23, 4  ;;  %s69_s28 = sshll.u32 %s1799_s7, 4  ;;  %s30_s24 = int_to_ptr.vmem [resolvable:$true] %s29_s24  ;;  %s70_s28 = int_to_ptr.hbm [resolvable:$true] %s69_s28 }
   0x9   :  { %35 = dma.hbm_to_vmem [thread:$0]  %s28_s20, 6144, %s30_s24, [#allocation3], %s1326_s21, %s1326_s21, %s1327_s22  }
   0xa   :  { %s1329_s29 = smov [#allocation7]   ;;  %s1330_s11 = smov [#allocation8]  }
   0xb   :  { %s58_s30 = sshll.u32 %s1329_s29, 4  ;;  %s71_s12 = sshll.u32 %s1330_s11, 4  ;;  %s59_s30 = int_to_ptr.vmem [resolvable:$true] %s58_s30  ;;  %s72_s12 = int_to_ptr.vmem [resolvable:$true] %s71_s12 }
   0xc   :  { %61 = dma.hbm_to_vmem [thread:$0]  %s57_s3, 64, %s59_s30, [#allocation6]  }
   0xd   :  { %74 = dma.hbm_to_vmem [thread:$0]  %s70_s28, 128, %s72_s12, [#allocation9]  }
   0xe   :  { %1317 = dma.done.wait [#allocation3], 6144  }
   0xf   :  { %1318 = vsyncadd [#allocation3], 4294961152 }
  0x10   :  { %1319 = dma.done.wait [#allocation6], 1088  }
  0x11   :  { %1320 = vsyncadd [#allocation6], 4294966208 }
  0x12   :  { %1321 = dma.done.wait [#allocation9], 128  }
  0x13   :  { %1322 = vsyncadd [#allocation9], 4294967168  ;;  %v1408_v0 = vld [vmem:[%s1792_s0 + $0x18] sm:$0xff]  ;;  %v1413_v1 = vld [vmem:[%s1792_s0 + $0x10] sm:$0xff]  ;;  %vm191_vm0 = vcmask 261120   ;;  %vm215_vm1 = vcmask 523264  }
  0x14   :  { %207 = vmatpush.msra.mxu0 %v1408_v0  ;;  %v172_v2 = vld [vmem:[%s1796_s4 + $0x38] sm:$0xff]  ;;  %v1422_v3 = vld [vmem:[%s1792_s0 + $0x8] sm:$0xff]  ;;  %v171_v4 = vld [vmem:[%s1796_s4 + $0x30] sm:$0xff]  ;;  %vm244_vm2 = vcmask 1043456   ;;  %vm240_vm3 = vcmask 31744   ;;  %vm281_vm4 = vcmask 1041408  }
  0x15   :  { %227 = vmatpush.msra.mxu1 %v172_v2  ;;  %v170_v5 = vld [vmem:[%s1796_s4 + $0x28] sm:$0xff]  ;;  %v1434_v6 = vld [vmem:[%s1792_s0] sm:$0xff]  ;;  %v168_v9 = vld [vmem:[%s1796_s4 + $0x18] sm:$0xff]  ;;  %vm268_vm5 = vcmask 15360   ;;  %s1099_s24 = sshll.u32 %s1802_s10, 4  ;;  %s1100_s24 = int_to_ptr.hbm [resolvable:$true] %s1099_s24 }
  0x16   :  { %208 = vmatpush.msra.mxu0 %v1413_v1  ;;  %v1440_v7 = vld [vmem:[%s1800_s8] sm:$0x3]  ;;  %v167_v10 = vld [vmem:[%s1796_s4 + $0x10] sm:$0xff]  ;;  %v166_v11 = vld [vmem:[%s1796_s4 + $0x8] sm:$0xff] }
  0x17   :  { %228 = vmatpush.msra.mxu1 %v171_v4  ;;  %v169_v8 = vld [vmem:[%s1796_s4 + $0x20] sm:$0xff]  ;;  %v1474_v19 = vld [vmem:[%s1801_s9 + $0x8] sm:$0xff]  ;;  %v1481_v20 = vld [vmem:[%s1801_s9 + $0x10] sm:$0xff] }
  0x18   :  { %209 = vmatpush.msra.mxu0 %v1422_v3  ;;  %v165_v12 = vld [vmem:[%s1796_s4] sm:$0xff]  ;;  %v1488_v21 = vld [vmem:[%s1801_s9 + $0x18] sm:$0xff]  ;;  %v1138_v46 = vld [vmem:[%s1793_s1 + $0x70] sm:$0xff] }
  0x19   :  { %229 = vmatpush.msra.mxu1 %v170_v5  ;;  %v173_v14 = vld [vmem:[#allocation7] sm:$0xf]  ;;  %v1139_v45 = vld [vmem:[%s1793_s1 + $0x78] sm:$0xff]  ;;  %v1137_v47 = vld [vmem:[%s1793_s1 + $0x68] sm:$0xff] }
  0x1a   :  { %210 = vmatpush.msra.mxu0 %v1434_v6  ;;  %1116 = vmatpush.msk.msra.mxu2 %vm244_vm2, %v173_v14  ;;  %v1466_v17 = vld [vmem:[%s1801_s9] sm:$0xff]  ;;  %v1135_v50 = vld [vmem:[%s1793_s1 + $0x58] sm:$0xff]  ;;  %v1134_v51 = vld [vmem:[%s1793_s1 + $0x50] sm:$0xff] }
  0x1b   :  { %1114 = vmatmul.msk.f32.vlgmr.msra.gmra.mxu0 %vm191_vm0, %v1440_v7  ;;  %230 = vmatpush.msra.mxu1 %v169_v8  ;;  %v1136_v48 = vld [vmem:[%s1793_s1 + $0x60] sm:$0xff]  ;;  %v1155_v52 = vld [vmem:[%s1793_s1 + $0xb8] sm:$0xff]  ;;  %v1133_v53 = vld [vmem:[%s1793_s1 + $0x48] sm:$0xff] }
  0x1c   :  { %353 = vmatpush.msrb.mxu0 %v172_v2  ;;  %v1154_v54 = vld [vmem:[%s1793_s1 + $0xb0] sm:$0xff]  ;;  %v1132_v55 = vld [vmem:[%s1793_s1 + $0x40] sm:$0xff]  ;;  %v1153_v56 = vld [vmem:[%s1793_s1 + $0xa8] sm:$0xff] }
  0x1d   :  { %231 = vmatpush.msra.mxu1 %v168_v9  ;;  %v1152_v57 = vld [vmem:[%s1793_s1 + $0xa0] sm:$0xff]  ;;  %v1151_v58 = vld [vmem:[%s1793_s1 + $0x98] sm:$0xff]  ;;  %v1150_v59 = vld [vmem:[%s1793_s1 + $0x90] sm:$0xff] }
  0x1e   :  { %354 = vmatpush.msrb.mxu0 %v171_v4  ;;  %v1149_v60 = vld [vmem:[%s1793_s1 + $0x88] sm:$0xff]  ;;  %v1148_v61 = vld [vmem:[%s1793_s1 + $0x80] sm:$0xff]  ;;  %v497_v62 = vld [vmem:[%s1793_s1 + $0x38] sm:$0xff] }
  0x1f   :  { %232 = vmatpush.msra.mxu1 %v167_v10  ;;  %v496_v63 = vld [vmem:[%s1793_s1 + $0x30] sm:$0xff]  ;;  %v495_v2 = vld [vmem:[%s1793_s1 + $0x28] sm:$0xff]  ;;  %v494_v4 = vld [vmem:[%s1793_s1 + $0x20] sm:$0xff] }
  0x20   :  { %355 = vmatpush.msrb.mxu0 %v170_v5  ;;  %v493_v5 = vld [vmem:[%s1793_s1 + $0x18] sm:$0xff] }
  0x21   :  { %233 = vmatpush.msra.mxu1 %v166_v11 }
  0x22   :  { %356 = vmatpush.msrb.mxu0 %v169_v8  ;;  %v492_v8 = vld [vmem:[%s1793_s1 + $0x10] sm:$0xff] }
  0x23   :  { %234 = vmatpush.msra.mxu1 %v165_v12 }
  0x24   :  { %357 = vmatpush.msrb.mxu0 %v168_v9  ;;  %v491_v9 = vld [vmem:[%s1793_s1 + $0x8] sm:$0xff] }
  0x26   :  { %358 = vmatpush.msrb.mxu0 %v167_v10  ;;  %v490_v10 = vld [vmem:[%s1793_s1] sm:$0xff] }
  0x28   :  { %359 = vmatpush.msrb.mxu0 %v166_v11 }
  0x2a   :  { %360 = vmatpush.msrb.mxu0 %v165_v12 }
  0x2c   :  { %618 = vmatpush.msra.mxu0 %v1155_v52 }
  0x2e   :  { %619 = vmatpush.msra.mxu0 %v1154_v54 }
  0x30   :  { %620 = vmatpush.msra.mxu0 %v1153_v56 }
  0x32   :  { %621 = vmatpush.msra.mxu0 %v1152_v57 }
  0x34   :  { %622 = vmatpush.msra.mxu0 %v1151_v58 }
  0x36   :  { %623 = vmatpush.msra.mxu0 %v1150_v59 }
  0x38   :  { %624 = vmatpush.msra.mxu0 %v1149_v60 }
  0x3a   :  { %625 = vmatpush.msra.mxu0 %v1148_v61 }
  0x98   :  { %v212_v13 = vpop.f32.mrf.mxu0 }
  0x99   :  { %1115 = vmatmul.msk.f32.vlgmr.msra.gmra.mxu1 %vm215_vm1, %v212_v13 }
 0x116   :  { %v236_v15 = vpop.f32.mrf.mxu1 }
 0x117   :  { %v239_v16 = vmul.f32 0.00390625, %v236_v15  ;;  %v104_v15 = vlaneseq }
 0x119   :  { %1117 = vmatmul.msk.f32.vlgmr.msra.gmra.mxu2 %vm240_vm3, %v239_v16 }
 0x19c   :  { %v265_v18 = vpop.f32.mrf.mxu2 }
 0x19d   :  { %1118 = vmatpush.msk.msra.mxu3 %vm281_vm4, %v265_v18 }
 0x19e   :  { %1119 = vmatmul.msk.f32.vlgmr.msra.gmra.mxu3 %vm268_vm5, %v1466_v17 }
 0x19f   :  { %568 = vmatpush.msrb.mxu3 %v497_v62 }
 0x1a1   :  { %569 = vmatpush.msrb.mxu3 %v496_v63 }
 0x1a3   :  { %570 = vmatpush.msrb.mxu3 %v495_v2 }
 0x1a5   :  { %571 = vmatpush.msrb.mxu3 %v494_v4 }
 0x1a6   :  { %1120 = vmatmul.msk.f32.gmra.mxu3 %vm268_vm5, %v1474_v19 }
 0x1a7   :  { %572 = vmatpush.msrb.mxu3 %v493_v5 }
 0x1a9   :  { %573 = vmatpush.msrb.mxu3 %v492_v8 }
 0x1ab   :  { %574 = vmatpush.msrb.mxu3 %v491_v9  ;;  %v189_v9 = vld [vmem:[%s1798_s6 + $0x78] sm:$0xff] }
 0x1ad   :  { %575 = vmatpush.msrb.mxu3 %v490_v10  ;;  %v188_v10 = vld [vmem:[%s1798_s6 + $0x70] sm:$0xff] }
 0x1ae   :  { %1121 = vmatmul.msk.f32.gmra.mxu3 %vm268_vm5, %v1481_v20 }
 0x1b6   :  { %1122 = vmatmul.msk.f32.gmra.mxu3 %vm268_vm5, %v1488_v21 }
 0x221   :  { %v302_v22 = vpop.f32.mrf.mxu3 }
 0x222   :  { %v1504_v30 = vsub.f32 %v1434_v6, %v302_v22  ;;  %v1601_v22 = vshrl.u32 %v104_v15, 7  ;;  %v185_v15 = vld [vmem:[%s1798_s6 + $0x58] sm:$0xff] }
 0x224   :  { %v318_v33 = vmul.f32 %v1504_v30, %v1504_v30  ;;  %vm473_vm11 = vcmp.lt.s32.totalorder %v1601_v22, 7 }
 0x229   :  { %v305_v23 = vpop.f32.mrf.mxu3 }
 0x22a   :  { %v1499_v28 = vsub.f32 %v1422_v3, %v305_v23 }
 0x22c   :  { %v319_v32 = vmul.f32 %v1499_v28, %v1499_v28 }
 0x231   :  { %v308_v24 = vpop.f32.mrf.mxu3 }
 0x232   :  { %v1493_v26 = vsub.f32 %v1413_v1, %v308_v24 }
 0x234   :  { %v320_v31 = vmul.f32 %v1493_v26, %v1493_v26 }
 0x239   :  { %v311_v25 = vpop.f32.mrf.mxu3 }
 0x23a   :  { %v1496_v27 = vsub.f32 %v1408_v0, %v311_v25 }
 0x23c   :  { %v321_v29 = vmul.f32 %v1496_v27, %v1496_v27 }
 0x23e   :  { %334 = vmatpush.msrb.mxu2 %v321_v29 }
 0x240   :  { %335 = vmatpush.msrb.mxu2 %v320_v31 }
 0x242   :  { %336 = vmatpush.msrb.mxu2 %v319_v32 }
 0x244   :  { %337 = vmatpush.msrb.mxu2 %v318_v33 }
 0x245   :  { %1123 = vmatmul.msk.f32.vlgmr.msrb.gmra.mxu2 %vm191_vm0, %v1440_v7 }
 0x246   :  { %1125 = vmatpush.msk.msra.mxu2 %vm244_vm2, %v173_v14  ;;  %vm452_vm2 = vcmp.lt.s32.totalorder %v1601_v22, 1 }
 0x248   :  { %527 = vmatpush.msrb.mxu2 %v1139_v45 }
 0x24a   :  { %528 = vmatpush.msrb.mxu2 %v1138_v46 }
 0x24c   :  { %529 = vmatpush.msrb.mxu2 %v1137_v47 }
 0x24e   :  { %530 = vmatpush.msrb.mxu2 %v1136_v48 }
 0x250   :  { %531 = vmatpush.msrb.mxu2 %v1135_v50 }
 0x252   :  { %532 = vmatpush.msrb.mxu2 %v1134_v51 }
 0x254   :  { %533 = vmatpush.msrb.mxu2 %v1133_v53 }
 0x256   :  { %534 = vmatpush.msrb.mxu2 %v1132_v55  ;;  %v107_v55 = vadd.s32 16, %v1601_v22 }
 0x258   :  { %v127_v59 = vand.u32 15, %v107_v55 }
 0x2c8   :  { %v339_v34 = vpop.f32.mrf.mxu2 }
 0x2c9   :  { %1124 = vmatmul.msk.f32.vlgmr.msrb.gmra.mxu0 %vm215_vm1, %v339_v34 }
 0x346   :  { %v362_v35 = vpop.f32.mrf.mxu0 }
 0x347   :  { %v365_v36 = vmul.f32 0.00390625, %v362_v35 }
 0x349   :  { %v366_v37 = vadd.f32 1e-05, %v365_v36 }
 0x34b   :  { %1193 = vrsqrt.f32 %v366_v37  ;;  %vm373_vm7 = vweird.f32 %v366_v37 }
 0x351   :  { %v1194_v38 = vpop.eup %1193 }
 0x352   :  { %v368_v39 = vmul.f32 %v1194_v38, %v366_v37  ;;  %vm374_vm6 = vweird.f32 %v1194_v38 }
 0x353   :  { %vm375_vm8 = vmor %vm373_vm7, %vm374_vm6  ;;  %vm1650_vm6 = vcmp.eq.s32.totalorder %v127_v59, 0  ;;  %vm684_vm7 = vcmask 64512  }
 0x354   :  { %v369_v40 = vmul.f32 %v1194_v38, %v368_v39 }
 0x356   :  { %v370_v41 = vmul.f32 0.5, %v369_v40 }
 0x358   :  { %v371_v42 = vsub.f32 1.5, %v370_v41  ;;  %v113_v41 = vand.u32 15, %v1601_v22 }
 0x35a   :  { %v372_v43 = vmul.f32 %v1194_v38, %v371_v42  ;;  %vm1624_vm15 = vcmp.eq.s32.totalorder %v113_v41, 0  ;;  %v176_v41 = vld [vmem:[%s1798_s6 + $0x10] sm:$0xff] }
 0x35c   :  { %v376_v44 = vsel %vm375_vm8, %v1194_v38, %v372_v43 }
 0x35d   :  { %1126 = vmatmul.msk.f32.vlgmr.msra.gmra.mxu2 %vm240_vm3, %v376_v44  ;;  %v108_v44 = vadd.s32 24, %v1601_v22 }
 0x35e   :  { %663 = vmatpush.msra.mxu2 %v189_v9 }
 0x35f   :  { %v134_v51 = vand.u32 15, %v108_v44  ;;  %v175_v44 = vld [vmem:[%s1798_s6 + $0x8] sm:$0xff] }
 0x360   :  { %664 = vmatpush.msra.mxu2 %v188_v10 }
 0x361   :  { %vm1637_vm3 = vcmp.eq.s32.totalorder %v134_v51, 15 }
 0x3e0   :  { %v397_v49 = vpop.f32.mrf.mxu2 }
 0x3e1   :  { %1127 = vmatpush.msk.msrb.mxu1 %vm281_vm4, %v397_v49 }
 0x3e2   :  { %1128 = vmatmul.msk.f32.vlgmr.msrb.gmra.mxu1 %vm268_vm5, %v1466_v17 }
 0x3ea   :  { %1129 = vmatmul.msk.f32.gmra.mxu1 %vm268_vm5, %v1474_v19 }
 0x3f2   :  { %1130 = vmatmul.msk.f32.gmra.mxu1 %vm268_vm5, %v1481_v20 }
 0x3fa   :  { %1131 = vmatmul.msk.f32.gmra.mxu1 %vm268_vm5, %v1488_v21 }
 0x45f   :  { %v420_v11 = vpop.f32.mrf.mxu1 }
 0x460   :  { %v432_v12 = vmul.f32 %v420_v11, %v1504_v30  ;;  %v106_v30 = vadd.s32 8, %v1601_v22 }
 0x462   :  { %vm436_vm9 = vcmp.ge.f32.partialorder %v432_v12, 0.0  ;;  %v440_v13 = vmul.f32 0.2, %v432_v12 }
 0x464   :  { %v444_v14 = vsel %vm436_vm9, %v432_v12, %v440_v13  ;;  %v187_v12 = vld [vmem:[%s1798_s6 + $0x68] sm:$0xff] }
 0x465   :  { %1140 = vmatmul.msk.f32.vlgmr.msrb.gmra.mxu2 %vm215_vm1, %v444_v14  ;;  %v469_v25 = vrot.slane %v444_v14, 1  ;;  %v448_v45 = vrot.slane %v444_v14, 7  ;;  %v186_v14 = vld [vmem:[%s1798_s6 + $0x60] sm:$0xff] }
 0x466   :  { %665 = vmatpush.msra.mxu2 %v187_v12 }
 0x467   :  { %v423_v16 = vpop.f32.mrf.mxu1 }
 0x468   :  { %v433_v18 = vmul.f32 %v423_v16, %v1499_v28  ;;  %v120_v28 = vand.u32 15, %v106_v30  ;;  %666 = vmatpush.msra.mxu2 %v186_v14  ;;  %v184_v16 = vld [vmem:[%s1798_s6 + $0x50] sm:$0xff]  ;;  %v181_v30 = vld [vmem:[%s1798_s6 + $0x38] sm:$0xff] }
 0x46a   :  { %v441_v23 = vmul.f32 0.2, %v433_v18  ;;  %vm437_vm10 = vcmp.ge.f32.partialorder %v433_v18, 0.0  ;;  %vm1611_vm13 = vcmp.eq.s32.totalorder %v120_v28, 15  ;;  %667 = vmatpush.msra.mxu2 %v185_v15 }
 0x46c   :  { %v445_v24 = vsel %vm437_vm10, %v433_v18, %v441_v23  ;;  %v183_v23 = vld [vmem:[%s1798_s6 + $0x48] sm:$0xff]  ;;  %668 = vmatpush.msra.mxu2 %v184_v16 }
 0x46d   :  { %v470_v29 = vrot.slane %v445_v24, 1  ;;  %1141 = vmatmul.msk.f32.gmra.mxu2 %vm215_vm1, %v445_v24  ;;  %v449_v52 = vrot.slane %v445_v24, 7 }
 0x46e   :  { %669 = vmatpush.msra.mxu2 %v183_v23 }
 0x46f   :  { %v426_v31 = vpop.f32.mrf.mxu1  ;;  %v476_v32 = vsel %vm473_vm11, %v469_v25, %v470_v29  ;;  %v455_v56 = vsel %vm452_vm2, %v448_v45, %v449_v52 }
 0x470   :  { %v434_v33 = vmul.f32 %v426_v31, %v1493_v26  ;;  %1156 = vmatmul.msk.f32.vlgmr.msra.gmra.mxu0 %vm215_vm1, %v476_v32  ;;  %v180_v31 = vld [vmem:[%s1798_s6 + $0x30] sm:$0xff]  ;;  %v179_v32 = vld [vmem:[%s1798_s6 + $0x28] sm:$0xff] }
 0x472   :  { %v442_v34 = vmul.f32 0.2, %v434_v33  ;;  %vm438_vm12 = vcmp.ge.f32.partialorder %v434_v33, 0.0 }
 0x474   :  { %v446_v35 = vsel %vm438_vm12, %v434_v33, %v442_v34  ;;  %v178_v34 = vld [vmem:[%s1798_s6 + $0x20] sm:$0xff]  ;;  %vm1178_vm12 = vmneg %vm1611_vm13 }
 0x475   :  { %v471_v36 = vrot.slane %v446_v35, 1  ;;  %1142 = vmatmul.msk.f32.gmra.mxu2 %vm215_vm1, %v446_v35  ;;  %v450_v58 = vrot.slane %v446_v35, 7 }
 0x477   :  { %v429_v38 = vpop.f32.mrf.mxu1  ;;  %v475_v39 = vsel %vm473_vm11, %v470_v29, %v471_v36  ;;  %v454_v61 = vsel %vm452_vm2, %v449_v52, %v450_v58  ;;  %v182_v29 = vld [vmem:[%s1798_s6 + $0x40] sm:$0xff] }
 0x478   :  { %v435_v40 = vmul.f32 %v429_v38, %v1496_v27  ;;  %v487_v26 = vsel %vm1611_vm13, 0.0, %v475_v39  ;;  %v467_v62 = vsel %vm1650_vm6, 0.0, %v454_v61  ;;  %670 = vmatpush.msra.mxu2 %v182_v29  ;;  %v177_v39 = vld [vmem:[%s1798_s6 + $0x18] sm:$0xff]  ;;  %vm1180_vm13 = vmneg %vm1637_vm3 }
 0x479   :  { %1157 = vmatmul.msk.f32.gmra.mxu0 %vm215_vm1, %v487_v26 }
 0x47a   :  { %v443_v42 = vmul.f32 0.2, %v435_v40  ;;  %vm439_vm14 = vcmp.ge.f32.partialorder %v435_v40, 0.0  ;;  %671 = vmatpush.msra.mxu2 %v181_v30 }
 0x47c   :  { %v447_v43 = vsel %vm439_vm14, %v435_v40, %v443_v42  ;;  %672 = vmatpush.msra.mxu2 %v180_v31 }
 0x47d   :  { %v451_v46 = vrot.slane %v447_v43, 7  ;;  %v472_v47 = vrot.slane %v447_v43, 1  ;;  %1143 = vmatmul.msk.f32.gmra.mxu2 %vm215_vm1, %v447_v43 }
 0x47e   :  { %673 = vmatpush.msra.mxu2 %v179_v32 }
 0x47f   :  { %v456_v27 = vsel %vm452_vm2, %v451_v46, %v448_v45  ;;  %v474_v49 = vsel %vm473_vm11, %v471_v36, %v472_v47  ;;  %v477_v54 = vsel %vm473_vm11, %v472_v47, %v469_v25  ;;  %v453_v63 = vsel %vm452_vm2, %v450_v58, %v451_v46  ;;  %v174_v47 = vld [vmem:[%s1798_s6] sm:$0xff]  ;;  %s1331_s6 = smov [#allocation10]  }
 0x480   :  { %v465_v50 = vsel %vm1624_vm15, 0.0, %v456_v27  ;;  %v489_v57 = vsel %vm1637_vm3, 0.0, %v477_v54  ;;  %674 = vmatpush.msra.mxu2 %v178_v34  ;;  %s1097_s9 = sshll.u32 %s1331_s6, 4  ;;  %s1098_s9 = int_to_ptr.vmem [resolvable:$true] %s1097_s9 }
 0x481   :  { %1144 = vmatmul.msk.f32.vlgmr.msrb.gmra.mxu3 %vm215_vm1, %v465_v50  ;;  %1158 = vmatmul.msk.f32.gmra.mxu0 %vm215_vm1, %v474_v49  ;;  %v190_v49 = vld [vmem:[#allocation8] sm:$0xff] }
 0x482   :  { %675 = vmatpush.msra.mxu2 %v177_v39 }
 0x484   :  { %676 = vmatpush.msra.mxu2 %v176_v41 }
 0x486   :  { %677 = vmatpush.msra.mxu2 %v175_v44 }
 0x488   :  { %678 = vmatpush.msra.mxu2 %v174_v47 }
 0x489   :  { %1145 = vmatmul.msk.f32.gmra.mxu3 %vm215_vm1, %v455_v56  ;;  %1159 = vmatmul.msk.f32.gmra.mxu0 %vm215_vm1, %v489_v57 }
 0x48a   :  { %818 = vmatpush.msrb.mxu2 %v190_v49 }
 0x491   :  { %1146 = vmatmul.msk.f32.gmra.mxu3 %vm215_vm1, %v467_v62 }
 0x499   :  { %1147 = vmatmul.msk.f32.gmra.mxu3 %vm215_vm1, %v453_v63 }
 0x4e8   :  { %v536_v2 = vpop.f32.mrf.mxu2 }
 0x4ed   :  { %v627_v4 = vpop.f32.mrf.mxu0 }
 0x4f0   :  { %v539_v8 = vpop.f32.mrf.mxu2 }
 0x4f6   :  { %v630_v11 = vpop.f32.mrf.mxu0 }
 0x4f8   :  { %v542_v18 = vpop.f32.mrf.mxu2 }
 0x4fe   :  { %v633_v24 = vpop.f32.mrf.mxu0 }
 0x500   :  { %v545_v33 = vpop.f32.mrf.mxu2 }
 0x504   :  { %v577_v5 = vpop.f32.mrf.mxu3 }
 0x505   :  { %v578_v42 = vadd.f32 %v577_v5, %v536_v2 }
 0x506   :  { %v636_v38 = vpop.f32.mrf.mxu0 }
 0x507   :  { %v639_v46 = vadd.f32 %v627_v4, %v578_v42  ;;  %v996_v42 = vld [vmem:[#allocation2 + $0x148] sm:$0xff] }
 0x50c   :  { %v580_v13 = vpop.f32.mrf.mxu3 }
 0x50d   :  { %v581_v40 = vadd.f32 %v580_v13, %v539_v8 }
 0x50f   :  { %v640_v45 = vadd.f32 %v630_v11, %v581_v40  ;;  %v998_v40 = vld [vmem:[#allocation2 + $0x158] sm:$0xff] }
 0x514   :  { %v583_v25 = vpop.f32.mrf.mxu3 }
 0x515   :  { %v584_v35 = vadd.f32 %v583_v25, %v542_v18  ;;  %v925_v25 = vld [vmem:[#allocation2 + $0xe8] sm:$0xff] }
 0x517   :  { %v641_v43 = vadd.f32 %v633_v24, %v584_v35  ;;  %v927_v24 = vld [vmem:[#allocation2 + $0xf8] sm:$0xff]  ;;  %v1000_v35 = vld [vmem:[#allocation2 + $0x168] sm:$0xff] }
 0x51c   :  { %v586_v28 = vpop.f32.mrf.mxu3 }
 0x51d   :  { %v587_v36 = vadd.f32 %v586_v28, %v545_v33  ;;  %v922_v33 = vld [vmem:[#allocation2 + $0xd0] sm:$0xff] }
 0x51e   :  { %v1001_v28 = vld [vmem:[#allocation2 + $0x170] sm:$0xff] }
 0x51f   :  { %v642_v26 = vadd.f32 %v636_v38, %v587_v36  ;;  %v920_v36 = vld [vmem:[#allocation2 + $0xc0] sm:$0xff] }
 0x520   :  { %v999_v38 = vld [vmem:[#allocation2 + $0x160] sm:$0xff] }
 0x521   :  { %655 = vmatpush.msra.mxu1 %v642_v26 }
 0x523   :  { %656 = vmatpush.msra.mxu1 %v641_v43 }
 0x525   :  { %657 = vmatpush.msra.mxu1 %v640_v45 }
 0x527   :  { %658 = vmatpush.msra.mxu1 %v639_v46 }
 0x528   :  { %1160 = vmatmul.msk.f32.vlgmr.msra.gmra.mxu1 %vm191_vm0, %v1440_v7 }
 0x529   :  { %703 = vmatpush.msrb.mxu1 %v190_v49  ;;  %v909_v49 = vld [vmem:[#allocation2 + $0x70] sm:$0xff] }
 0x52b   :  { %768 = vmatpush.msra.mxu1 %v189_v9 }
 0x52d   :  { %769 = vmatpush.msra.mxu1 %v188_v10 }
 0x52f   :  { %770 = vmatpush.msra.mxu1 %v187_v12 }
 0x531   :  { %771 = vmatpush.msra.mxu1 %v186_v14 }
 0x533   :  { %772 = vmatpush.msra.mxu1 %v185_v15 }
 0x535   :  { %773 = vmatpush.msra.mxu1 %v184_v16 }
 0x537   :  { %774 = vmatpush.msra.mxu1 %v183_v23 }
 0x539   :  { %775 = vmatpush.msra.mxu1 %v182_v29  ;;  %v924_v29 = vld [vmem:[#allocation2 + $0xe0] sm:$0xff] }
 0x53b   :  { %776 = vmatpush.msra.mxu1 %v181_v30 }
 0x53d   :  { %777 = vmatpush.msra.mxu1 %v180_v31  ;;  %v923_v31 = vld [vmem:[#allocation2 + $0xd8] sm:$0xff] }
 0x53f   :  { %778 = vmatpush.msra.mxu1 %v179_v32  ;;  %v1002_v32 = vld [vmem:[#allocation2 + $0x178] sm:$0xff] }
 0x541   :  { %779 = vmatpush.msra.mxu1 %v178_v34  ;;  %v921_v34 = vld [vmem:[#allocation2 + $0xc8] sm:$0xff] }
 0x543   :  { %780 = vmatpush.msra.mxu1 %v177_v39  ;;  %v919_v39 = vld [vmem:[#allocation2 + $0xb8] sm:$0xff] }
 0x545   :  { %781 = vmatpush.msra.mxu1 %v176_v41  ;;  %v917_v41 = vld [vmem:[#allocation2 + $0xa8] sm:$0xff] }
 0x547   :  { %782 = vmatpush.msra.mxu1 %v175_v44  ;;  %v915_v44 = vld [vmem:[#allocation2 + $0x98] sm:$0xff] }
 0x549   :  { %783 = vmatpush.msra.mxu1 %v174_v47  ;;  %v994_v47 = vld [vmem:[#allocation2 + $0x138] sm:$0xff] }
 0x5a5   :  { %v660_v27 = vpop.f32.mrf.mxu1 }
 0x5a6   :  { %679 = vmatmul.f32.vlgmr.msra.gmra.mxu2 %v660_v27  ;;  %v913_v27 = vld [vmem:[#allocation2 + $0x88] sm:$0xff] }
 0x629   :  { %v680_v50 = vpop.f32.mrf.mxu2 }
 0x62a   :  { %v683_v51 = vmul.f32 0.00390625, %v680_v50  ;;  %v993_v50 = vld [vmem:[#allocation2 + $0x130] sm:$0xff] }
 0x62c   :  { %1161 = vmatmul.msk.f32.vlgmr.msrb.gmra.mxu1 %vm684_vm7, %v683_v51  ;;  %v912_v51 = vld [vmem:[#allocation2 + $0x80] sm:$0xff] }
 0x6a9   :  { %v705_v52 = vpop.f32.mrf.mxu1 }
 0x6aa   :  { %1162 = vmatpush.msk.msra.mxu3 %vm281_vm4, %v705_v52  ;;  %v992_v52 = vld [vmem:[#allocation2 + $0x128] sm:$0xff] }
 0x6ab   :  { %1163 = vmatmul.msk.f32.vlgmr.msra.gmra.mxu3 %vm268_vm5, %v1466_v17 }
 0x6ac   :  { %928 = vmatpush.msrb.mxu3 %v927_v24  ;;  %v1041_v24 = vld [vmem:[#allocation5 + $0x28] sm:$0xff] }
 0x6b3   :  { %1164 = vmatmul.msk.f32.gmra.mxu3 %vm268_vm5, %v1474_v19 }
 0x6bb   :  { %1165 = vmatmul.msk.f32.gmra.mxu3 %vm268_vm5, %v1481_v20 }
 0x6c3   :  { %1166 = vmatmul.msk.f32.gmra.mxu3 %vm268_vm5, %v1488_v21 }
 0x72e   :  { %v728_v54 = vpop.f32.mrf.mxu3 }
 0x72f   :  { %v1730_v63 = vsub.f32 %v639_v46, %v728_v54  ;;  %v910_v46 = vld [vmem:[#allocation2 + $0x78] sm:$0xff]  ;;  %v991_v54 = vld [vmem:[#allocation2 + $0x120] sm:$0xff] }
 0x730   :  { %957 = vmatpush.msra.mxu2 %v910_v46 }
 0x731   :  { %v744_v5 = vmul.f32 %v1730_v63, %v1730_v63 }
 0x732   :  { %958 = vmatpush.msra.mxu2 %v909_v49 }
 0x736   :  { %v731_v55 = vpop.f32.mrf.mxu3 }
 0x737   :  { %v1726_v61 = vsub.f32 %v640_v45, %v731_v55  ;;  %v914_v45 = vld [vmem:[#allocation2 + $0x90] sm:$0xff]  ;;  %v906_v55 = vld [vmem:[#allocation2 + $0x58] sm:$0xff] }
 0x739   :  { %v745_v4 = vmul.f32 %v1726_v61, %v1726_v61 }
 0x73e   :  { %v734_v56 = vpop.f32.mrf.mxu3 }
 0x73f   :  { %v1722_v58 = vsub.f32 %v641_v43, %v734_v56  ;;  %v916_v43 = vld [vmem:[#allocation2 + $0xa0] sm:$0xff]  ;;  %v990_v56 = vld [vmem:[#allocation2 + $0x118] sm:$0xff] }
 0x741   :  { %v746_v2 = vmul.f32 %v1722_v58, %v1722_v58 }
 0x746   :  { %v737_v57 = vpop.f32.mrf.mxu3 }
 0x747   :  { %v1724_v59 = vsub.f32 %v642_v26, %v737_v57  ;;  %v997_v26 = vld [vmem:[#allocation2 + $0x150] sm:$0xff] }
 0x748   :  { %v905_v57 = vld [vmem:[#allocation2 + $0x50] sm:$0xff] }
 0x749   :  { %v747_v62 = vmul.f32 %v1724_v59, %v1724_v59 }
 0x74b   :  { %760 = vmatpush.msrb.mxu0 %v747_v62  ;;  %v989_v62 = vld [vmem:[#allocation2 + $0x110] sm:$0xff] }
 0x74d   :  { %761 = vmatpush.msrb.mxu0 %v746_v2  ;;  %v904_v2 = vld [vmem:[#allocation2 + $0x48] sm:$0xff] }
 0x74f   :  { %762 = vmatpush.msrb.mxu0 %v745_v4  ;;  %v988_v4 = vld [vmem:[#allocation2 + $0x108] sm:$0xff] }
 0x751   :  { %763 = vmatpush.msrb.mxu0 %v744_v5  ;;  %v903_v5 = vld [vmem:[#allocation2 + $0x40] sm:$0xff] }
 0x752   :  { %1167 = vmatmul.msk.f32.vlgmr.msrb.gmra.mxu0 %vm191_vm0, %v1440_v7  ;;  %v926_v7 = vld [vmem:[#allocation2 + $0xf0] sm:$0xff] }
 0x753   :  { %929 = vmatpush.msrb.mxu3 %v926_v7 }
 0x755   :  { %930 = vmatpush.msrb.mxu3 %v925_v25 }
 0x757   :  { %931 = vmatpush.msrb.mxu3 %v924_v29  ;;  %v1040_v29 = vld [vmem:[#allocation5 + $0x20] sm:$0xff] }
 0x759   :  { %932 = vmatpush.msrb.mxu3 %v923_v31 }
 0x75b   :  { %933 = vmatpush.msrb.mxu3 %v922_v33 }
 0x75d   :  { %934 = vmatpush.msrb.mxu3 %v921_v34 }
 0x75f   :  { %935 = vmatpush.msrb.mxu3 %v920_v36  ;;  %v1036_v36 = vld [vmem:[#allocation5] sm:$0xff] }
 0x761   :  { %936 = vmatpush.msrb.mxu3 %v919_v39 }
 0x7cf   :  { %v765_v8 = vpop.f32.mrf.mxu0 }
 0x7d0   :  { %784 = vmatmul.f32.vlgmr.msra.gmra.mxu1 %v765_v8  ;;  %v987_v8 = vld [vmem:[#allocation2 + $0x100] sm:$0xff] }
 0x84d   :  { %v785_v9 = vpop.f32.mrf.mxu1 }
 0x84e   :  { %v788_v10 = vmul.f32 0.00390625, %v785_v9  ;;  %v902_v9 = vld [vmem:[#allocation2 + $0x38] sm:$0xff] }
 0x850   :  { %v789_v11 = vadd.f32 1e-05, %v788_v10  ;;  %v901_v10 = vld [vmem:[#allocation2 + $0x30] sm:$0xff] }
 0x852   :  { %1195 = vrsqrt.f32 %v789_v11  ;;  %vm796_vm9 = vweird.f32 %v789_v11 }
 0x858   :  { %v1196_v12 = vpop.eup %1195 }
 0x859   :  { %v791_v13 = vmul.f32 %v1196_v12, %v789_v11  ;;  %vm797_vm8 = vweird.f32 %v1196_v12  ;;  %v900_v11 = vld [vmem:[#allocation2 + $0x28] sm:$0xff] }
 0x85a   :  { %vm798_vm10 = vmor %vm796_vm9, %vm797_vm8 }
 0x85b   :  { %v792_v14 = vmul.f32 %v1196_v12, %v791_v13  ;;  %v898_v13 = vld [vmem:[#allocation2 + $0x18] sm:$0xff] }
 0x85d   :  { %v793_v15 = vmul.f32 0.5, %v792_v14  ;;  %v897_v14 = vld [vmem:[#allocation2 + $0x10] sm:$0xff] }
 0x85f   :  { %v794_v16 = vsub.f32 1.5, %v793_v15  ;;  %v1043_v15 = vld [vmem:[#allocation5 + $0x38] sm:$0xff] }
 0x860   :  { %1064 = vmatpush.msrb.mxu1 %v1043_v15 }
 0x861   :  { %v795_v18 = vmul.f32 %v1196_v12, %v794_v16  ;;  %v896_v16 = vld [vmem:[#allocation2 + $0x8] sm:$0xff] }
 0x863   :  { %v799_v23 = vsel %vm798_vm10, %v1196_v12, %v795_v18  ;;  %v899_v12 = vld [vmem:[#allocation2 + $0x20] sm:$0xff]  ;;  %v1042_v18 = vld [vmem:[#allocation5 + $0x30] sm:$0xff] }
 0x864   :  { %1168 = vmatmul.msk.f32.vlgmr.msrb.gmra.mxu2 %vm684_vm7, %v799_v23  ;;  %1065 = vmatpush.msrb.mxu1 %v1042_v18  ;;  %v895_v23 = vld [vmem:[#allocation2] sm:$0xff]  ;;  %vm1174_vm7 = vmneg %vm1624_vm15 }
 0x865   :  { %vm1176_vm15 = vmneg %vm1650_vm6 }
 0x866   :  { %1066 = vmatpush.msrb.mxu1 %v1041_v24 }
 0x868   :  { %1067 = vmatpush.msrb.mxu1 %v1040_v29 }
 0x8e7   :  { %v820_v30 = vpop.f32.mrf.mxu2 }
 0x8e8   :  { %1169 = vmatpush.msk.msra.mxu0 %vm281_vm4, %v820_v30  ;;  %v1039_v30 = vld [vmem:[#allocation5 + $0x18] sm:$0xff] }
 0x8e9   :  { %1170 = vmatmul.msk.f32.vlgmr.msra.gmra.mxu0 %vm268_vm5, %v1466_v17  ;;  %v918_v17 = vld [vmem:[#allocation2 + $0xb0] sm:$0xff]  ;;  %1068 = vmatpush.msrb.mxu1 %v1039_v30 }
 0x8ea   :  { %1003 = vmatpush.msrb.mxu0 %v1002_v32  ;;  %937 = vmatpush.msrb.mxu3 %v918_v17  ;;  %v1038_v32 = vld [vmem:[#allocation5 + $0x10] sm:$0xff] }
 0x8eb   :  { %1069 = vmatpush.msrb.mxu1 %v1038_v32 }
 0x8ec   :  { %1004 = vmatpush.msrb.mxu0 %v1001_v28  ;;  %938 = vmatpush.msrb.mxu3 %v917_v41  ;;  %v1037_v28 = vld [vmem:[#allocation5 + $0x8] sm:$0xff] }
 0x8ed   :  { %1070 = vmatpush.msrb.mxu1 %v1037_v28 }
 0x8ee   :  { %1005 = vmatpush.msrb.mxu0 %v1000_v35  ;;  %939 = vmatpush.msrb.mxu3 %v916_v43 }
 0x8ef   :  { %1071 = vmatpush.msrb.mxu1 %v1036_v36 }
 0x8f0   :  { %1006 = vmatpush.msrb.mxu0 %v999_v38  ;;  %940 = vmatpush.msrb.mxu3 %v915_v44 }
 0x8f1   :  { %1171 = vmatmul.msk.f32.gmra.mxu0 %vm268_vm5, %v1474_v19  ;;  %v995_v19 = vld [vmem:[#allocation2 + $0x140] sm:$0xff]  ;;  %1182 = vmatmul.msk.f32.vlgmr.msrb.gmra.mxu1 %vm215_vm1, %v1434_v6 }
 0x8f2   :  { %1007 = vmatpush.msrb.mxu0 %v998_v40  ;;  %941 = vmatpush.msrb.mxu3 %v914_v45 }
 0x8f4   :  { %1008 = vmatpush.msrb.mxu0 %v997_v26  ;;  %942 = vmatpush.msrb.mxu3 %v913_v27 }
 0x8f6   :  { %1009 = vmatpush.msrb.mxu0 %v996_v42  ;;  %943 = vmatpush.msrb.mxu3 %v912_v51 }
 0x8f8   :  { %1010 = vmatpush.msrb.mxu0 %v995_v19 }
 0x8f9   :  { %1172 = vmatmul.msk.f32.gmra.mxu0 %vm268_vm5, %v1481_v20  ;;  %v908_v20 = vld [vmem:[#allocation2 + $0x68] sm:$0xff]  ;;  %1183 = vmatmul.msk.f32.gmra.mxu1 %vm215_vm1, %v1422_v3 }
 0x8fa   :  { %1011 = vmatpush.msrb.mxu0 %v994_v47  ;;  %959 = vmatpush.msra.mxu2 %v908_v20 }
 0x8fc   :  { %1012 = vmatpush.msrb.mxu0 %v993_v50 }
 0x8fe   :  { %1013 = vmatpush.msrb.mxu0 %v992_v52 }
 0x900   :  { %1014 = vmatpush.msrb.mxu0 %v991_v54 }
 0x901   :  { %1173 = vmatmul.msk.f32.gmra.mxu0 %vm268_vm5, %v1488_v21  ;;  %v907_v21 = vld [vmem:[#allocation2 + $0x60] sm:$0xff]  ;;  %1184 = vmatmul.msk.f32.gmra.mxu1 %vm215_vm1, %v1413_v1 }
 0x902   :  { %960 = vmatpush.msra.mxu2 %v907_v21  ;;  %1015 = vmatpush.msrb.mxu0 %v990_v56 }
 0x904   :  { %961 = vmatpush.msra.mxu2 %v906_v55  ;;  %1016 = vmatpush.msrb.mxu0 %v989_v62 }
 0x906   :  { %962 = vmatpush.msra.mxu2 %v905_v57  ;;  %1017 = vmatpush.msrb.mxu0 %v988_v4 }
 0x908   :  { %963 = vmatpush.msra.mxu2 %v904_v2  ;;  %1018 = vmatpush.msrb.mxu0 %v987_v8 }
 0x909   :  { %1185 = vmatmul.msk.f32.gmra.mxu1 %vm215_vm1, %v1408_v0 }
 0x90a   :  { %964 = vmatpush.msra.mxu2 %v903_v5 }
 0x90c   :  { %965 = vmatpush.msra.mxu2 %v902_v9 }
 0x90e   :  { %966 = vmatpush.msra.mxu2 %v901_v10 }
 0x910   :  { %967 = vmatpush.msra.mxu2 %v900_v11 }
 0x912   :  { %968 = vmatpush.msra.mxu2 %v899_v12 }
 0x914   :  { %969 = vmatpush.msra.mxu2 %v898_v13 }
 0x916   :  { %970 = vmatpush.msra.mxu2 %v897_v14 }
 0x918   :  { %971 = vmatpush.msra.mxu2 %v896_v16 }
 0x91a   :  { %972 = vmatpush.msra.mxu2 %v895_v23 }
 0x966   :  { %v843_v7 = vpop.f32.mrf.mxu0 }
 0x967   :  { %v855_v25 = vmul.f32 %v843_v7, %v1730_v63 }
 0x969   :  { %vm859_vm0 = vcmp.ge.f32.partialorder %v855_v25, 0.0  ;;  %v863_v31 = vmul.f32 0.2, %v855_v25 }
 0x96b   :  { %v867_v33 = vsel %vm859_vm0, %v855_v25, %v863_v31 }
 0x96c   :  { %944 = vmatmul.f32.vlgmr.msrb.gmra.mxu3 %v867_v33  ;;  %v883_v39 = vrot.slane %v867_v33, 1  ;;  %v871_v3 = vrot.slane %v867_v33, 7 }
 0x96e   :  { %v846_v34 = vpop.f32.mrf.mxu0  ;;  %v1073_v51 = vpop.f32.mrf.mxu1 }
 0x96f   :  { %v856_v35 = vmul.f32 %v846_v34, %v1726_v61 }
 0x971   :  { %v864_v38 = vmul.f32 0.2, %v856_v35  ;;  %vm860_vm4 = vcmp.ge.f32.partialorder %v856_v35, 0.0 }
 0x973   :  { %v868_v63 = vsel %vm860_vm4, %v856_v35, %v864_v38 }
 0x974   :  { %v884_v40 = vrot.slane %v868_v63, 1  ;;  %947 = vmatmul.f32.gmra.mxu3 %v868_v63  ;;  %v872_v1 = vrot.slane %v868_v63, 7 }
 0x976   :  { %v849_v17 = vpop.f32.mrf.mxu0  ;;  %v889_v26 = vsel %vm473_vm11, %v883_v39, %v884_v40  ;;  %v877_v48 = vsel %vm452_vm2, %v871_v3, %v872_v1  ;;  %v1076_v57 = vpop.f32.mrf.mxu1 }
 0x977   :  { %v857_v41 = vmul.f32 %v849_v17, %v1722_v58  ;;  %1019 = vmatmul.f32.vlgmr.msrb.gmra.mxu0 %v889_v26 }
 0x979   :  { %v865_v42 = vmul.f32 0.2, %v857_v41  ;;  %vm861_vm5 = vcmp.ge.f32.partialorder %v857_v41, 0.0 }
 0x97b   :  { %v869_v61 = vsel %vm861_vm5, %v857_v41, %v865_v42 }
 0x97c   :  { %v885_v43 = vrot.slane %v869_v61, 1  ;;  %950 = vmatmul.f32.gmra.mxu3 %v869_v61  ;;  %v873_v49 = vrot.slane %v869_v61, 7 }
 0x97e   :  { %v852_v6 = vpop.f32.mrf.mxu0  ;;  %v888_v44 = vsel %vm473_vm11, %v884_v40, %v885_v43  ;;  %v876_v50 = vsel %vm452_vm2, %v872_v1, %v873_v49  ;;  %v1079_v22 = vpop.f32.mrf.mxu1 }
 0x97f   :  { %v858_v19 = vmul.f32 %v852_v6, %v1724_v59  ;;  %1179 = vmatmul.msk.f32.gmra.mxu0 %vm1178_vm12, %v888_v44 }
 0x981   :  { %v866_v58 = vmul.f32 0.2, %v858_v19  ;;  %vm862_vm14 = vcmp.ge.f32.partialorder %v858_v19, 0.0 }
 0x983   :  { %v870_v45 = vsel %vm862_vm14, %v858_v19, %v866_v58 }
 0x984   :  { %v874_v46 = vrot.slane %v870_v45, 7  ;;  %v886_v37 = vrot.slane %v870_v45, 1  ;;  %953 = vmatmul.f32.gmra.mxu3 %v870_v45 }
 0x986   :  { %v878_v47 = vsel %vm452_vm2, %v874_v46, %v871_v3  ;;  %v887_v59 = vsel %vm473_vm11, %v885_v43, %v886_v37  ;;  %v890_v27 = vsel %vm473_vm11, %v886_v37, %v883_v39  ;;  %v875_v0 = vsel %vm452_vm2, %v873_v49, %v874_v46  ;;  %v1082_v23 = vpop.f32.mrf.mxu1 }
 0x987   :  { %1175 = vmatmul.msk.f32.vlgmr.msra.gmra.mxu2 %vm1174_vm7, %v878_v47  ;;  %1025 = vmatmul.f32.gmra.mxu0 %v887_v59 }
 0x98f   :  { %976 = vmatmul.f32.gmra.mxu2 %v877_v48  ;;  %1181 = vmatmul.msk.f32.gmra.mxu0 %vm1180_vm13, %v890_v27 }
 0x997   :  { %1177 = vmatmul.msk.f32.gmra.mxu2 %vm1176_vm15, %v876_v50 }
 0x99f   :  { %982 = vmatmul.f32.gmra.mxu2 %v875_v0 }
 0x9ef   :  { %v945_v53 = vpop.f32.mrf.mxu3 }
 0x9f4   :  { %v1020_v20 = vpop.f32.mrf.mxu0 }
 0x9f7   :  { %v948_v55 = vpop.f32.mrf.mxu3 }
 0x9fc   :  { %v1023_v62 = vpop.f32.mrf.mxu0 }
 0x9ff   :  { %v951_v8 = vpop.f32.mrf.mxu3 }
 0xa04   :  { %v1026_v9 = vpop.f32.mrf.mxu0 }
 0xa07   :  { %v954_v14 = vpop.f32.mrf.mxu3 }
 0xa0a   :  { %v974_v52 = vpop.f32.mrf.mxu2 }
 0xa0b   :  { %v975_v21 = vadd.f32 %v974_v52, %v945_v53 }
 0xa0c   :  { %v1029_v18 = vpop.f32.mrf.mxu0 }
 0xa0d   :  { %v1032_v54 = vadd.f32 %v1020_v20, %v975_v21 }
 0xa0f   :  { %v1085_v56 = vadd.f32 %v1073_v51, %v1032_v54 }
 0xa11   :  { %1089 = vst [vmem:[#allocation10] sm:$0xff] %v1085_v56 }
 0xa12   :  { %v977_v60 = vpop.f32.mrf.mxu2 }
 0xa13   :  { %v978_v2 = vadd.f32 %v977_v60, %v948_v55 }
 0xa15   :  { %v1033_v4 = vadd.f32 %v1023_v62, %v978_v2 }
 0xa17   :  { %v1086_v5 = vadd.f32 %v1076_v57, %v1033_v4 }
 0xa19   :  { %1090 = vst [vmem:[#allocation10 + $0x8] sm:$0xff] %v1086_v5 }
 0xa1a   :  { %v980_v10 = vpop.f32.mrf.mxu2 }
 0xa1b   :  { %v981_v11 = vadd.f32 %v980_v10, %v951_v8 }
 0xa1d   :  { %v1034_v12 = vadd.f32 %v1026_v9, %v981_v11 }
 0xa1f   :  { %v1087_v13 = vadd.f32 %v1079_v22, %v1034_v12 }
 0xa21   :  { %1091 = vst [vmem:[#allocation10 + $0x10] sm:$0xff] %v1087_v13 }
 0xa22   :  { %v983_v15 = vpop.f32.mrf.mxu2 }
 0xa23   :  { %v984_v16 = vadd.f32 %v983_v15, %v954_v14 }
 0xa25   :  { %v1035_v24 = vadd.f32 %v1029_v18, %v984_v16 }
 0xa27   :  { %v1088_v7 = vadd.f32 %v1082_v23, %v1035_v24 }
 0xa29   :  { %1092 = vst [vmem:[#allocation10 + $0x18] sm:$0xff] %v1088_v7 }
 0xa2a   :  { %1105 = dma.vmem_to_hbm [thread:$0]  %s1098_s9, 512, %s1100_s24, [#allocation4], %s1326_s21, %s1326_s21, %s1327_s22  }
 0xa2b   :  { %1323 = dma.done.wait [#allocation4], 512  }
 0xa2c   :  { %1324 = vsyncadd [#allocation4], 4294966784 }
 0xa2d   :  { %1110 = vsyncpa [#allocation3], 1 }
 0xa2e   :  { %1111 = vsyncpa [#allocation6], 1 }
 0xa2f   :  { %1112 = vsyncpa [#allocation9], 1 }
 0xa30   :  { %1113 = vsyncpa [#allocation4], 1 }

</bundles_post_ra>
